<compile_context>
chip_gen: v7x
topology: tpu7x:2x2x1
jax: 0.10.0
libtpu: 0.0.40
codegen_flags: <defaults>
</compile_context>

<pallas_src>
import functools

import jax
import jax.numpy as jnp
from jax.experimental import pallas as pl
from jax.experimental.pallas import tpu as pltpu


_LANES = 128
_SUBLANES = 8
# Per-tile byte budget for the main operand. With Pallas double-buffering the
# input and output this is ~4x scoped VMEM (~16 MiB), comfortably under the
# 32 MiB limit requested below on every generation (v5e/v6e/v7x).
_TILE_BYTES = 4 * 1024 * 1024
_VMEM_LIMIT = 32 * 1024 * 1024


def _round_up(x, m):
    return (x + m - 1) // m * m


def _pick_tile(total, unit_bytes, granule):
    """Largest tile along a dim of size `total` (multiple of `granule`, or the
    full dim if it fits in one block) whose footprint stays under the budget."""
    tile = (_TILE_BYTES // max(unit_bytes, 1)) // granule * granule
    tile = max(granule, tile)
    if total <= tile:
        return total          # single block == full dim (always a legal block shape)
    return tile


# --------------------------------------------------------------------------
# Kernels
# --------------------------------------------------------------------------
def _ln_lanes_kernel(x_ref, w_ref, b_ref, o_ref, *, eps):
    # Fallback path: rows on sublanes, channels on lanes; reduce over lanes.
    x = x_ref[...].astype(jnp.float32)                       # (TM, C)
    mean = jnp.mean(x, axis=-1, keepdims=True)
    xc = x - mean
    var = jnp.mean(xc * xc, axis=-1, keepdims=True)           # biased variance
    inv = jax.lax.rsqrt(var + eps)
    o_ref[...] = (xc * inv * w_ref[...] + b_ref[...]).astype(o_ref.dtype)


def _ln_packed_kernel(x_ref, w_ref, b_ref, seg_ref, o_ref, *, eps, c):
    # Lane-dense path (C < 128, 128 % C == 0): each 128-lane row holds 128//C
    # independent channel groups. Segmented (per-group) sums are computed on
    # the MXU via a block-diagonal ones matrix; a bf16 hi/lo split of the
    # operand keeps ~f32 accuracy at 4 cheap bf16 matmuls per tile.
    x = x_ref[...].astype(jnp.float32)                        # (TM, 128)
    seg = seg_ref[...]                                         # (128, 128) bf16, 0/1
    inv_c = jnp.float32(1.0 / c)

    def seg_sum(v):
        hi = v.astype(jnp.bfloat16)
        lo = (v - hi.astype(jnp.float32)).astype(jnp.bfloat16)
        return (jnp.dot(hi, seg, preferred_element_type=jnp.float32)
                + jnp.dot(lo, seg, preferred_element_type=jnp.float32))

    mean = seg_sum(x) * inv_c                                  # broadcast within group
    xc = x - mean
    var = seg_sum(xc * xc) * inv_c                             # biased variance
    inv = jax.lax.rsqrt(var + eps)
    o_ref[...] = (xc * inv * w_ref[...] + b_ref[...]).astype(o_ref.dtype)


def _ln_sublanes_kernel(x_ref, w_ref, b_ref, o_ref, *, eps):
    # channels_first path: channels on sublanes, spatial (H*W) lane-dense.
    x = x_ref[...].astype(jnp.float32)                        # (TB, C, T)
    mean = jnp.mean(x, axis=1, keepdims=True)                  # (TB, 1, T)
    xc = x - mean
    var = jnp.mean(xc * xc, axis=1, keepdims=True)             # biased variance
    inv = jax.lax.rsqrt(var + eps)
    o_ref[...] = (xc * inv * w_ref[...] + b_ref[...]).astype(o_ref.dtype)


# --------------------------------------------------------------------------
# Wrappers
# --------------------------------------------------------------------------
def _layernorm_rows(x2d, weight, bias, eps):
    """Normalize each row of a (rows, C) slab over C (channels_last)."""
    rows, c = x2d.shape
    use_packed = (c < _LANES and _LANES % c == 0 and rows > 0
                  and rows % (_LANES // c) == 0)

    params = pltpu.CompilerParams(
        dimension_semantics=("parallel",),
        vmem_limit_bytes=_VMEM_LIMIT)

    if use_packed:
        k = _LANES // c
        xp = x2d.reshape(rows // k, _LANES)          # free: contiguous reshape
        prows = xp.shape[0]
        w128 = jnp.tile(weight.astype(jnp.float32).reshape(-1), k).reshape(1, _LANES)
        b128 = jnp.tile(bias.astype(jnp.float32).reshape(-1), k).reshape(1, _LANES)
        # Block-diagonal ones: seg[i, j] = 1 iff i//c == j//c (exact in bf16).
        seg = jnp.kron(jnp.eye(k, dtype=jnp.float32),
                       jnp.ones((c, c), jnp.float32)).astype(jnp.bfloat16)
        tm = _pick_tile(prows, _LANES * 4, _SUBLANES)

        out = pl.pallas_call(
            functools.partial(_ln_packed_kernel, eps=eps, c=c),
            out_shape=jax.ShapeDtypeStruct(xp.shape, x2d.dtype),
            grid_spec=pltpu.PrefetchScalarGridSpec(
                num_scalar_prefetch=0,
                grid=(pl.cdiv(prows, tm),),
                in_specs=[
                    pl.BlockSpec((tm, _LANES), lambda i: (i, 0)),
                    pl.BlockSpec((1, _LANES), lambda i: (0, 0)),
                    pl.BlockSpec((1, _LANES), lambda i: (0, 0)),
                    pl.BlockSpec((_LANES, _LANES), lambda i: (0, 0)),
                ],
                out_specs=pl.BlockSpec((tm, _LANES), lambda i: (i, 0)),
            ),
            compiler_params=params,
        )(xp, w128, b128, seg)
        return out.reshape(rows, c)

    # Fallback: channels directly on the lane axis (lane-dense iff C % 128 == 0).
    w2d = weight.astype(jnp.float32).reshape(1, c)
    b2d = bias.astype(jnp.float32).reshape(1, c)
    tm = _pick_tile(rows, _round_up(c, _LANES) * 4, _SUBLANES)

    out = pl.pallas_call(
        functools.partial(_ln_lanes_kernel, eps=eps),
        out_shape=jax.ShapeDtypeStruct((rows, c), x2d.dtype),
        grid_spec=pltpu.PrefetchScalarGridSpec(
            num_scalar_prefetch=0,
            grid=(pl.cdiv(rows, tm),),
            in_specs=[
                pl.BlockSpec((tm, c), lambda i: (i, 0)),
                pl.BlockSpec((1, c), lambda i: (0, 0)),
                pl.BlockSpec((1, c), lambda i: (0, 0)),
            ],
            out_specs=pl.BlockSpec((tm, c), lambda i: (i, 0)),
        ),
        compiler_params=params,
    )(x2d, w2d, b2d)
    return out


def _layernorm_channels_first(x, weight, bias, eps):
    """(B, C, H, W): normalize over C without any transpose."""
    b, c, h, w = x.shape
    hw = h * w
    x3 = x.reshape(b, c, hw)                          # free: contiguous reshape
    w3 = weight.astype(jnp.float32).reshape(1, c, 1)
    b3 = bias.astype(jnp.float32).reshape(1, c, 1)

    unit = _round_up(c, _SUBLANES) * 4                # bytes per lane column
    t_hw = _pick_tile(hw, unit, _LANES)
    if t_hw == hw:
        tb = min(b, max(1, _TILE_BYTES // max(unit * hw, 1)))
    else:
        tb = 1

    out = pl.pallas_call(
        functools.partial(_ln_sublanes_kernel, eps=eps),
        out_shape=jax.ShapeDtypeStruct((b, c, hw), x.dtype),
        grid_spec=pltpu.PrefetchScalarGridSpec(
            num_scalar_prefetch=0,
            grid=(pl.cdiv(b, tb), pl.cdiv(hw, t_hw)),
            in_specs=[
                pl.BlockSpec((tb, c, t_hw), lambda i, j: (i, 0, j)),
                pl.BlockSpec((1, c, 1), lambda i, j: (0, 0, 0)),
                pl.BlockSpec((1, c, 1), lambda i, j: (0, 0, 0)),
            ],
            out_specs=pl.BlockSpec((tb, c, t_hw), lambda i, j: (i, 0, j)),
        ),
        compiler_params=pltpu.CompilerParams(
            dimension_semantics=("parallel", "parallel"),
            vmem_limit_bytes=_VMEM_LIMIT),
    )(x3, w3, b3)
    return out.reshape(b, c, h, w)


def layer_norm(x, weight, bias, eps=1e-6, data_format="channels_last"):
    if data_format not in ("channels_last", "channels_first"):
        raise NotImplementedError
    if data_format == "channels_last":
        orig_shape = x.shape
        c = orig_shape[-1]
        out = _layernorm_rows(x.reshape(-1, c), weight, bias, eps)
        return out.reshape(orig_shape)
    # channels_first: (B, C, H, W), normalize over axis 1.
    return _layernorm_channels_first(x, weight, bias, eps)


# --------------------------------------------------------------------------
# Reference + self-test
# --------------------------------------------------------------------------
def _ref_layer_norm(x, weight, bias, eps, data_format):
    if data_format == "channels_last":
        mean = jnp.mean(x, axis=-1, keepdims=True)
        var = jnp.mean((x - mean) ** 2, axis=-1, keepdims=True)
        return (x - mean) / jnp.sqrt(var + eps) * weight + bias
    mean = jnp.mean(x, axis=1, keepdims=True)
    var = jnp.mean((x - mean) ** 2, axis=1, keepdims=True)
    xn = (x - mean) / jnp.sqrt(var + eps)
    return weight[None, :, None, None] * xn + bias[None, :, None, None]


if __name__ == "__main__":
    key = jax.random.PRNGKey(0)
    k1, k2, k3, k4, k5, k6, k7 = jax.random.split(key, 7)

    C = 32
    weight = jax.random.normal(k1, (C,), jnp.float32)
    bias = jax.random.normal(k2, (C,), jnp.float32)

    # channels_first: (B, C, H, W) — sublane-reduction kernel, no transposes.
    x_cf = jax.random.normal(k3, (2, C, 16, 16), jnp.float32)
    out_cf = jax.block_until_ready(
        layer_norm(x_cf, weight, bias, eps=1e-6, data_format="channels_first"))
    ref_cf = _ref_layer_norm(x_cf, weight, bias, 1e-6, "channels_first")
    assert jnp.allclose(out_cf, ref_cf, atol=1e-4, rtol=1e-4)

    # channels_last: (B, H, W, C) — lane-dense packed path (128 % 32 == 0).
    x_cl = jax.random.normal(k4, (2, 16, 16, C), jnp.float32)
    out_cl = jax.block_until_ready(
        layer_norm(x_cl, weight, bias, eps=1e-6, data_format="channels_last"))
    ref_cl = _ref_layer_norm(x_cl, weight, bias, 1e-6, "channels_last")
    assert jnp.allclose(out_cl, ref_cl, atol=1e-4, rtol=1e-4)

    # channels_last fallback path (C does not divide 128).
    C2 = 48
    w2 = jax.random.normal(k5, (C2,), jnp.float32)
    b2 = jax.random.normal(k6, (C2,), jnp.float32)
    x_fb = jax.random.normal(k7, (3, 5, C2), jnp.float32)
    out_fb = jax.block_until_ready(
        layer_norm(x_fb, w2, b2, eps=1e-6, data_format="channels_last"))
    ref_fb = _ref_layer_norm(x_fb, w2, b2, 1e-6, "channels_last")
    assert jnp.allclose(out_fb, ref_fb, atol=1e-4, rtol=1e-4)

    print("KERNEL_OK")
</pallas_src>

<mosaic_0001>
module attributes {stable_mosaic.version = 11 : i64} {
  func.func @_ln_sublanes_kernel(%arg0: i32, %arg1: i32, %arg2: memref<2x32x256xf32, #tpu.memory_space<vmem>>, %arg3: memref<1x32x1xf32, #tpu.memory_space<vmem>>, %arg4: memref<1x32x1xf32, #tpu.memory_space<vmem>>, %arg5: memref<2x32x256xf32, #tpu.memory_space<vmem>>) attributes {dimension_semantics = [#tpu.dimension_semantics<parallel>, #tpu.dimension_semantics<parallel>], iteration_bounds = array<i64: 1, 1>, scalar_prefetch = 0 : i64, scratch_operands = 0 : i64, tpu.core_type = #tpu.core_type<tc>, window_params = [{transform_indices = @transform_0, window_bounds = array<i64: 2, 32, 256>}, {pipeline_mode = #tpu.pipeline_mode<synchronous>, transform_indices = @transform_1, window_bounds = array<i64: 1, 32, 1>}, {pipeline_mode = #tpu.pipeline_mode<synchronous>, transform_indices = @transform_2, window_bounds = array<i64: 1, 32, 1>}, {transform_indices = @transform_3, window_bounds = array<i64: 2, 32, 256>}]} {
    %c0 = arith.constant 0 : index
    %c0_0 = arith.constant 0 : index
    %c0_1 = arith.constant 0 : index
    %0 = vector.load %arg2[%c0, %c0_0, %c0_1] : memref<2x32x256xf32, #tpu.memory_space<vmem>>, vector<2x32x256xf32>
    %cst = arith.constant dense<0.000000e+00> : vector<2x256xf32>
    %1 = vector.multi_reduction <add>, %0, %cst [1] : vector<2x32x256xf32> to vector<2x256xf32>
    %2 = vector.shape_cast %1 : vector<2x256xf32> to vector<2x1x256xf32>
    %cst_2 = arith.constant 3.200000e+01 : f32
    %3 = vector.broadcast %cst_2 : f32 to vector<2x1x256xf32>
    %4 = arith.divf %2, %3 : vector<2x1x256xf32>
    %5 = vector.broadcast %4 : vector<2x1x256xf32> to vector<2x32x256xf32>
    %6 = arith.subf %0, %5 : vector<2x32x256xf32>
    %7 = arith.mulf %6, %6 : vector<2x32x256xf32>
    %cst_3 = arith.constant dense<0.000000e+00> : vector<2x256xf32>
    %8 = vector.multi_reduction <add>, %7, %cst_3 [1] : vector<2x32x256xf32> to vector<2x256xf32>
    %9 = vector.shape_cast %8 : vector<2x256xf32> to vector<2x1x256xf32>
    %cst_4 = arith.constant 3.200000e+01 : f32
    %10 = vector.broadcast %cst_4 : f32 to vector<2x1x256xf32>
    %11 = arith.divf %9, %10 : vector<2x1x256xf32>
    %cst_5 = arith.constant 9.99999997E-7 : f32
    %12 = vector.broadcast %cst_5 : f32 to vector<2x1x256xf32>
    %13 = arith.addf %11, %12 : vector<2x1x256xf32>
    %14 = math.rsqrt %13 : vector<2x1x256xf32>
    %15 = vector.broadcast %14 : vector<2x1x256xf32> to vector<2x32x256xf32>
    %16 = arith.mulf %6, %15 : vector<2x32x256xf32>
    %c0_6 = arith.constant 0 : index
    %c0_7 = arith.constant 0 : index
    %c0_8 = arith.constant 0 : index
    %17 = vector.load %arg3[%c0_6, %c0_7, %c0_8] : memref<1x32x1xf32, #tpu.memory_space<vmem>>, vector<1x32x1xf32>
    %18 = vector.broadcast %17 : vector<1x32x1xf32> to vector<2x32x256xf32>
    %19 = arith.mulf %16, %18 : vector<2x32x256xf32>
    %c0_9 = arith.constant 0 : index
    %c0_10 = arith.constant 0 : index
    %c0_11 = arith.constant 0 : index
    %20 = vector.load %arg4[%c0_9, %c0_10, %c0_11] : memref<1x32x1xf32, #tpu.memory_space<vmem>>, vector<1x32x1xf32>
    %21 = vector.broadcast %20 : vector<1x32x1xf32> to vector<2x32x256xf32>
    %22 = arith.addf %19, %21 : vector<2x32x256xf32>
    %c0_12 = arith.constant 0 : index
    %c0_13 = arith.constant 0 : index
    %c0_14 = arith.constant 0 : index
    %23 = vector.load %arg5[%c0_12, %c0_13, %c0_14] : memref<2x32x256xf32, #tpu.memory_space<vmem>>, vector<2x32x256xf32>
    tpu.vector_store %arg5[%c0_12, %c0_13, %c0_14], %22 {strides = array<i32>} : memref<2x32x256xf32, #tpu.memory_space<vmem>>, vector<2x32x256xf32>,
    return
  }
  func.func @transform_0(%arg0: i32, %arg1: i32) -> (i32, i32, i32) {
    %c0_i32 = arith.constant 0 : i32
    %c0_i32_0 = arith.constant 0 : i32
    return %arg0, %c0_i32, %arg1 : i32, i32, i32
  }
  func.func @transform_1(%arg0: i32, %arg1: i32) -> (i32, i32, i32) {
    %c0_i32 = arith.constant 0 : i32
    %c0_i32_0 = arith.constant 0 : i32
    %c0_i32_1 = arith.constant 0 : i32
    %c0_i32_2 = arith.constant 0 : i32
    return %c0_i32, %c0_i32_0, %c0_i32_1 : i32, i32, i32
  }
  func.func @transform_2(%arg0: i32, %arg1: i32) -> (i32, i32, i32) {
    %c0_i32 = arith.constant 0 : i32
    %c0_i32_0 = arith.constant 0 : i32
    %c0_i32_1 = arith.constant 0 : i32
    %c0_i32_2 = arith.constant 0 : i32
    return %c0_i32, %c0_i32_0, %c0_i32_1 : i32, i32, i32
  }
  func.func @transform_3(%arg0: i32, %arg1: i32) -> (i32, i32, i32) {
    %c0_i32 = arith.constant 0 : i32
    %c0_i32_0 = arith.constant 0 : i32
    return %arg0, %c0_i32, %arg1 : i32, i32, i32
  }
}

</mosaic_0001>

<bundles_post_ra>
// kernel: tpu_custom_call.1
= control target key start
LH: loop header
LB: loop body
LE: loop exit
PB: predicated region body
PF: predicated region fallthrough
CT: control target
= control target key end

     0   :  { %8 = vsyncpa [#allocation3], 0  ;;  %s517_s0 = inlined_call_operand.hbm [shape: f32[2,32,256], index: 0, kind: input, shape index: {}]   ;;  %s518_s1 = inlined_call_operand.vmem [shape: f32[1,32,1], index: 1, kind: input, shape index: {}]   ;;  %s519_s2 = inlined_call_operand.vmem [shape: f32[1,32,1], index: 2, kind: input, shape index: {}]   ;;  %s520_s3 = inlined_call_operand.hbm [shape: f32[2,32,256], index: 3, kind: output, shape index: {}]  }
   0x1   :  { %9 = vsyncpa [#allocation4], 0  ;;  %s358_s12 = smov [#allocation2]   ;;  %s310_s16 = scalar_lea.hbm %s517_s0, 2048 }
   0x2   :  { %s15_s13 = sshll.u32 %s358_s12, 4  ;;  %p311_p0 = scmp.ne.s32.totalorder %s517_s0, %s310_s16  ;;  %s16_s13 = int_to_ptr.vmem [resolvable:$true] %s15_s13 }
   0x3   :  { %p314_p1 = scmp.lt.u32.totalorder %s310_s16, %s517_s0 }
   0x5   :  { %p316_p2 = pnand %p314_p1, %p311_p0 }
   0x7   :  { %319 = shalt.err (!%p316_p2)
}
   0x8   :  { %s320_s21 = scalar_lea.vmem %s16_s13, 2048  ;;  %p325_p4 = scmp.lt.s32.totalorder %s16_s13, %s16_s13 }
   0x9   :  { %p321_p3 = scmp.ne.s32.totalorder %s16_s13, %s320_s21  ;;  %p326_p5 = scmp.lt.s32.totalorder %s320_s21, %s320_s21 }
   0xb   :  { %p327_p6 = por %p326_p5, %p325_p4 }
   0xd   :  { %p328_p7 = pnand %p327_p6, %p321_p3 }
   0xf   :  { %331 = shalt.err (!%p328_p7)
}
  0x10   :  { %s359_s22 = smov 256   ;;  %s360_s23 = smov 16  }
  0x11   :  { %21 = dma.hbm_to_vmem [thread:$0]  %s517_s0, 2048, %s16_s13, [#allocation3], %s359_s22, %s359_s22, %s360_s23  }
  0x12   :  { %354 = dma.done.wait [#allocation3], 2048  }
  0x13   :  { %355 = vsyncadd [#allocation3], 4294965248  ;;  %v361_v0 = vmov 0   ;;  %v184_v1 = vld [vmem:[%s518_s1 + $0x10] sm:$0xff]  ;;  %v182_v2 = vld [vmem:[%s518_s1] sm:$0xff] }
  0x14   :  { %301 = vset.pattern.permute.xlu1 %v361_v0  ;;  %300 = vset.pattern.permute.xlu0 %v361_v0  ;;  %v185_v3 = vld [vmem:[%s518_s1 + $0x18] sm:$0xff]  ;;  %v183_v4 = vld [vmem:[%s518_s1 + $0x8] sm:$0xff]  ;;  %v222_v6 = vld [vmem:[%s519_s2] sm:$0xff]  ;;  %s362_s1 = smov [#allocation5]  }
  0x15   :  { %198 = vperm.xlu1 %301, %v184_v1   ;;  %188 = vperm.xlu0 %300, %v182_v2   ;;  %v223_v5 = vld [vmem:[%s519_s2 + $0x8] sm:$0xff]  ;;  %v225_v7 = vld [vmem:[%s519_s2 + $0x18] sm:$0xff]  ;;  %v224_v8 = vld [vmem:[%s519_s2 + $0x10] sm:$0xff]  ;;  %s283_s2 = sshll.u32 %s362_s1, 4  ;;  %s284_s2 = int_to_ptr.vmem [resolvable:$true] %s283_s2 }
  0x16   :  { %v29_v9 = vld [vmem:[#allocation2] sm:$0xff]  ;;  %v31_v10 = vld [vmem:[#allocation2 + $0x10] sm:$0xff]  ;;  %v30_v11 = vld [vmem:[#allocation2 + $0x8] sm:$0xff]  ;;  %s332_s14 = scalar_lea.vmem %s284_s2, 2048  ;;  %p337_p9 = scmp.lt.s32.totalorder %s284_s2, %s284_s2 }
  0x17   :  { %v32_v12 = vld [vmem:[#allocation2 + $0x18] sm:$0xff]  ;;  %v37_v13 = vld [vmem:[#allocation2 + $0x40] sm:$0xff]  ;;  %v39_v14 = vld [vmem:[#allocation2 + $0x50] sm:$0xff]  ;;  %v45_v17 = vadd.f32 %v31_v10, %v29_v9  ;;  %p333_p8 = scmp.ne.s32.totalorder %s284_s2, %s332_s14  ;;  %p338_p10 = scmp.lt.s32.totalorder %s332_s14, %s332_s14 }
  0x18   :  { %v38_v15 = vld [vmem:[#allocation2 + $0x48] sm:$0xff]  ;;  %v40_v16 = vld [vmem:[#allocation2 + $0x58] sm:$0xff]  ;;  %v33_v18 = vld [vmem:[#allocation2 + $0x20] sm:$0xff]  ;;  %v54_v19 = vadd.f32 %v32_v12, %v30_v11  ;;  %v63_v21 = vadd.f32 %v39_v14, %v37_v13 }
  0x19   :  { %203 = vperm.xlu1 %301, %v185_v3   ;;  %193 = vperm.xlu0 %300, %v183_v4   ;;  %v34_v20 = vld [vmem:[#allocation2 + $0x28] sm:$0xff]  ;;  %v41_v22 = vld [vmem:[#allocation2 + $0x60] sm:$0xff]  ;;  %v72_v23 = vadd.f32 %v40_v16, %v38_v15  ;;  %v46_v25 = vadd.f32 %v45_v17, %v33_v18  ;;  %v35_v26 = vld [vmem:[#allocation2 + $0x30] sm:$0xff]  ;;  %p339_p11 = por %p338_p10, %p337_p9 }
  0x1a   :  { %v42_v24 = vld [vmem:[#allocation2 + $0x68] sm:$0xff]  ;;  %v55_v27 = vadd.f32 %v54_v19, %v34_v20  ;;  %v36_v28 = vld [vmem:[#allocation2 + $0x38] sm:$0xff]  ;;  %v64_v29 = vadd.f32 %v63_v21, %v41_v22  ;;  %v43_v30 = vld [vmem:[#allocation2 + $0x70] sm:$0xff] }
  0x1b   :  { %v73_v31 = vadd.f32 %v72_v23, %v42_v24  ;;  %v44_v32 = vld [vmem:[#allocation2 + $0x78] sm:$0xff]  ;;  %v47_v33 = vadd.f32 %v46_v25, %v35_v26  ;;  %p340_p12 = pnand %p339_p11, %p333_p8 }
  0x1c   :  { %v56_v34 = vadd.f32 %v55_v27, %v36_v28  ;;  %v65_v35 = vadd.f32 %v64_v29, %v43_v30 }
  0x1d   :  { %233 = vperm.xlu1 %301, %v223_v5   ;;  %228 = vperm.xlu0 %300, %v222_v6   ;;  %v74_v36 = vadd.f32 %v73_v31, %v44_v32  ;;  %v48_v37 = vrot.slane %v47_v33, 4 }
  0x1e   :  { %v57_v38 = vrot.slane %v56_v34, 4  ;;  %v66_v39 = vrot.slane %v65_v35, 4 }
  0x1f   :  { %v75_v40 = vrot.slane %v74_v36, 4  ;;  %v49_v41 = vadd.f32 %v48_v37, %v47_v33 }
  0x20   :  { %v58_v42 = vadd.f32 %v57_v38, %v56_v34  ;;  %v67_v43 = vadd.f32 %v66_v39, %v65_v35 }
  0x21   :  { %243 = vperm.xlu1 %301, %v225_v7   ;;  %238 = vperm.xlu0 %300, %v224_v8   ;;  %v76_v44 = vadd.f32 %v75_v40, %v74_v36  ;;  %v50_v45 = vrot.slane %v49_v41, 2 }
  0x22   :  { %v59_v46 = vrot.slane %v58_v42, 2  ;;  %v68_v47 = vrot.slane %v67_v43, 2 }
  0x23   :  { %v77_v48 = vrot.slane %v76_v44, 2  ;;  %v51_v49 = vadd.f32 %v50_v45, %v49_v41 }
  0x24   :  { %v60_v50 = vadd.f32 %v59_v46, %v58_v42  ;;  %v69_v51 = vadd.f32 %v68_v47, %v67_v43 }
  0x25   :  { %v78_v52 = vadd.f32 %v77_v48, %v76_v44  ;;  %v52_v53 = vrot.slane %v51_v49, 1 }
  0x26   :  { %v61_v54 = vrot.slane %v60_v50, 1  ;;  %v70_v55 = vrot.slane %v69_v51, 1 }
  0x27   :  { %v79_v56 = vrot.slane %v78_v52, 1  ;;  %v53_v57 = vadd.f32 %v52_v53, %v51_v49 }
  0x28   :  { %v62_v58 = vadd.f32 %v61_v54, %v60_v50  ;;  %v71_v59 = vadd.f32 %v70_v55, %v69_v51 }
  0x29   :  { %v80_v60 = vadd.f32 %v79_v56, %v78_v52  ;;  %v82_v61 = vmul.f32 0.03125, %v53_v57 }
  0x2a   :  { %v83_v62 = vmul.f32 0.03125, %v62_v58  ;;  %v84_v63 = vmul.f32 0.03125, %v71_v59 }
  0x2b   :  { %v85_v0 = vmul.f32 0.03125, %v80_v60  ;;  %v422_v1 = vsub.f32 %v29_v9, %v82_v61  ;;  %v424_v2 = vsub.f32 %v31_v10, %v82_v61  ;;  %v438_v17 = vsub.f32 %v33_v18, %v82_v61 }
  0x2c   :  { %v426_v3 = vsub.f32 %v30_v11, %v83_v62  ;;  %v428_v4 = vsub.f32 %v32_v12, %v83_v62  ;;  %v430_v5 = vsub.f32 %v37_v13, %v84_v63  ;;  %v432_v6 = vsub.f32 %v39_v14, %v84_v63 }
  0x2d   :  { %v434_v7 = vsub.f32 %v38_v15, %v85_v0  ;;  %v436_v8 = vsub.f32 %v40_v16, %v85_v0  ;;  %v102_v9 = vmul.f32 %v422_v1, %v422_v1  ;;  %v104_v10 = vmul.f32 %v424_v2, %v424_v2 }
  0x2e   :  { %v444_v11 = vsub.f32 %v34_v20, %v83_v62  ;;  %v103_v12 = vmul.f32 %v426_v3, %v426_v3  ;;  %v105_v13 = vmul.f32 %v428_v4, %v428_v4  ;;  %v450_v14 = vsub.f32 %v41_v22, %v84_v63 }
  0x2f   :  { %v110_v15 = vmul.f32 %v430_v5, %v430_v5  ;;  %v112_v16 = vmul.f32 %v432_v6, %v432_v6  ;;  %v456_v18 = vsub.f32 %v42_v24, %v85_v0  ;;  %v111_v19 = vmul.f32 %v434_v7, %v434_v7 }
  0x30   :  { %v113_v20 = vmul.f32 %v436_v8, %v436_v8  ;;  %v462_v21 = vsub.f32 %v35_v26, %v82_v61  ;;  %v106_v22 = vmul.f32 %v438_v17, %v438_v17  ;;  %v118_v23 = vadd.f32 %v104_v10, %v102_v9 }
  0x31   :  { %v466_v25 = vsub.f32 %v36_v28, %v83_v62  ;;  %v107_v27 = vmul.f32 %v444_v11, %v444_v11  ;;  %v127_v29 = vadd.f32 %v105_v13, %v103_v12  ;;  %v470_v24 = vsub.f32 %v43_v30, %v84_v63 }
  0x32   :  { %v114_v31 = vmul.f32 %v450_v14, %v450_v14  ;;  %v136_v33 = vadd.f32 %v112_v16, %v110_v15  ;;  %v474_v34 = vsub.f32 %v44_v32, %v85_v0  ;;  %v115_v26 = vmul.f32 %v456_v18, %v456_v18 }
  0x33   :  { %v145_v35 = vadd.f32 %v113_v20, %v111_v19  ;;  %v108_v28 = vmul.f32 %v462_v21, %v462_v21  ;;  %v119_v36 = vadd.f32 %v118_v23, %v106_v22  ;;  %v109_v37 = vmul.f32 %v466_v25, %v466_v25 }
  0x34   :  { %v128_v38 = vadd.f32 %v127_v29, %v107_v27  ;;  %v116_v30 = vmul.f32 %v470_v24, %v470_v24  ;;  %v137_v39 = vadd.f32 %v136_v33, %v114_v31  ;;  %v117_v32 = vmul.f32 %v474_v34, %v474_v34 }
  0x35   :  { %v146_v40 = vadd.f32 %v145_v35, %v115_v26  ;;  %v120_v41 = vadd.f32 %v119_v36, %v108_v28 }
  0x36   :  { %v129_v42 = vadd.f32 %v128_v38, %v109_v37  ;;  %v138_v43 = vadd.f32 %v137_v39, %v116_v30 }
  0x37   :  { %v147_v44 = vadd.f32 %v146_v40, %v117_v32  ;;  %v121_v45 = vrot.slane %v120_v41, 4 }
  0x38   :  { %v130_v46 = vrot.slane %v129_v42, 4  ;;  %v139_v47 = vrot.slane %v138_v43, 4 }
  0x39   :  { %v148_v48 = vrot.slane %v147_v44, 4  ;;  %v122_v49 = vadd.f32 %v121_v45, %v120_v41 }
  0x3a   :  { %v131_v50 = vadd.f32 %v130_v46, %v129_v42  ;;  %v140_v51 = vadd.f32 %v139_v47, %v138_v43 }
  0x3b   :  { %v149_v52 = vadd.f32 %v148_v48, %v147_v44  ;;  %v123_v53 = vrot.slane %v122_v49, 2 }
  0x3c   :  { %v132_v54 = vrot.slane %v131_v50, 2  ;;  %v141_v55 = vrot.slane %v140_v51, 2 }
  0x3d   :  { %v150_v56 = vrot.slane %v149_v52, 2  ;;  %v124_v57 = vadd.f32 %v123_v53, %v122_v49 }
  0x3e   :  { %v133_v58 = vadd.f32 %v132_v54, %v131_v50  ;;  %v142_v59 = vadd.f32 %v141_v55, %v140_v51 }
  0x3f   :  { %v151_v60 = vadd.f32 %v150_v56, %v149_v52  ;;  %v125_v61 = vrot.slane %v124_v57, 1 }
  0x40   :  { %v134_v62 = vrot.slane %v133_v58, 1  ;;  %v143_v63 = vrot.slane %v142_v59, 1 }
  0x41   :  { %v152_v0 = vrot.slane %v151_v60, 1  ;;  %v126_v9 = vadd.f32 %v125_v61, %v124_v57 }
  0x42   :  { %v135_v10 = vadd.f32 %v134_v62, %v133_v58  ;;  %v144_v12 = vadd.f32 %v143_v63, %v142_v59 }
  0x43   :  { %v153_v13 = vadd.f32 %v152_v0, %v151_v60  ;;  %v154_v15 = vmul.f32 0.03125, %v126_v9 }
  0x44   :  { %v155_v16 = vmul.f32 0.03125, %v135_v10  ;;  %v156_v19 = vmul.f32 0.03125, %v144_v12 }
  0x45   :  { %v157_v20 = vmul.f32 0.03125, %v153_v13  ;;  %v158_v22 = vadd.f32 1e-06, %v154_v15 }
  0x46   :  { %v159_v23 = vadd.f32 1e-06, %v155_v16  ;;  %v160_v27 = vadd.f32 1e-06, %v156_v19 }
  0x47   :  { %v161_v29 = vadd.f32 1e-06, %v157_v20  ;;  %302 = vrsqrt.f32 %v158_v22 }
  0x48   :  { %304 = vrsqrt.f32 %v159_v23 }
  0x49   :  { %306 = vrsqrt.f32 %v160_v27 }
  0x4a   :  { %308 = vrsqrt.f32 %v161_v29 }
  0x51   :  { %v303_v31 = vpop.eup %302 }
  0x52   :  { %v305_v33 = vpop.eup %304  ;;  %v168_v37 = vmul.f32 %v303_v31, %v424_v2  ;;  %v166_v32 = vmul.f32 %v303_v31, %v422_v1  ;;  %v172_v45 = vmul.f32 %v303_v31, %v462_v21 }
  0x53   :  { %v307_v26 = vpop.eup %306  ;;  %v169_v38 = vmul.f32 %v305_v33, %v428_v4  ;;  %v167_v40 = vmul.f32 %v305_v33, %v426_v3  ;;  %v173_v2 = vmul.f32 %v305_v33, %v466_v25  ;;  %v170_v4 = vmul.f32 %v303_v31, %v438_v17 }
  0x54   :  { %v309_v36 = vpop.eup %308  ;;  %v176_v30 = vmul.f32 %v307_v26, %v432_v6  ;;  %v174_v41 = vmul.f32 %v307_v26, %v430_v5  ;;  %v171_v6 = vmul.f32 %v305_v33, %v444_v11  ;;  %v178_v3 = vmul.f32 %v307_v26, %v450_v14 }
  0x55   :  { %v177_v39 = vmul.f32 %v309_v36, %v436_v8  ;;  %v175_v42 = vmul.f32 %v309_v36, %v434_v7  ;;  %v180_v8 = vmul.f32 %v307_v26, %v470_v24  ;;  %v181_v1 = vmul.f32 %v309_v36, %v474_v34 }
  0x56   :  { %v179_v5 = vmul.f32 %v309_v36, %v456_v18 }
  0x94   :  { %v199_v35 = vpop.permute.xlu1 %198  ;;  %v189_v28 = vpop.permute.xlu0 %188 }
  0x95   :  { %v206_v49 = vmul.f32 %v189_v28, %v166_v32  ;;  %v207_v21 = vmul.f32 %v189_v28, %v167_v40  ;;  %v214_v50 = vmul.f32 %v189_v28, %v174_v41  ;;  %v215_v25 = vmul.f32 %v189_v28, %v175_v42 }
  0x96   :  { %v210_v61 = vmul.f32 %v199_v35, %v170_v4  ;;  %v211_v62 = vmul.f32 %v199_v35, %v171_v6  ;;  %v218_v63 = vmul.f32 %v199_v35, %v178_v3  ;;  %v219_v0 = vmul.f32 %v199_v35, %v179_v5 }
  0x98   :  { %v204_v43 = vpop.permute.xlu1 %203  ;;  %v194_v44 = vpop.permute.xlu0 %193 }
  0x99   :  { %v208_v46 = vmul.f32 %v194_v44, %v168_v37  ;;  %v209_v7 = vmul.f32 %v194_v44, %v169_v38  ;;  %v216_v47 = vmul.f32 %v194_v44, %v176_v30  ;;  %v217_v48 = vmul.f32 %v194_v44, %v177_v39 }
  0x9a   :  { %v212_v18 = vmul.f32 %v204_v43, %v172_v45  ;;  %v213_v56 = vmul.f32 %v204_v43, %v173_v2  ;;  %v220_v57 = vmul.f32 %v204_v43, %v180_v8  ;;  %v221_v58 = vmul.f32 %v204_v43, %v181_v1 }
  0x9c   :  { %v234_v51 = vpop.permute.xlu1 %233  ;;  %v229_v17 = vpop.permute.xlu0 %228 }
  0x9d   :  { %v248_v52 = vadd.f32 %v234_v51, %v208_v46  ;;  %v249_v11 = vadd.f32 %v234_v51, %v209_v7  ;;  %v256_v53 = vadd.f32 %v234_v51, %v216_v47  ;;  %v257_v24 = vadd.f32 %v234_v51, %v217_v48 }
  0x9e   :  { %v246_v54 = vadd.f32 %v229_v17, %v206_v49  ;;  %v247_v34 = vadd.f32 %v229_v17, %v207_v21  ;;  %v254_v55 = vadd.f32 %v229_v17, %v214_v50  ;;  %v255_v14 = vadd.f32 %v229_v17, %v215_v25 }
  0x9f   :  { %264 = vst [vmem:[#allocation5 + $0x10] sm:$0xff] %v248_v52  ;;  %265 = vst [vmem:[#allocation5 + $0x18] sm:$0xff] %v249_v11 }
  0xa0   :  { %272 = vst [vmem:[#allocation5 + $0x50] sm:$0xff] %v256_v53  ;;  %273 = vst [vmem:[#allocation5 + $0x58] sm:$0xff] %v257_v24  ;;  %v244_v59 = vpop.permute.xlu1 %243  ;;  %v239_v60 = vpop.permute.xlu0 %238 }
  0xa1   :  { %262 = vst [vmem:[#allocation5] sm:$0xff] %v246_v54  ;;  %263 = vst [vmem:[#allocation5 + $0x8] sm:$0xff] %v247_v34  ;;  %v252_v9 = vadd.f32 %v244_v59, %v212_v18  ;;  %v253_v10 = vadd.f32 %v244_v59, %v213_v56  ;;  %v260_v12 = vadd.f32 %v244_v59, %v220_v57 }
  0xa2   :  { %270 = vst [vmem:[#allocation5 + $0x40] sm:$0xff] %v254_v55  ;;  %271 = vst [vmem:[#allocation5 + $0x48] sm:$0xff] %v255_v14  ;;  %v261_v13 = vadd.f32 %v244_v59, %v221_v58  ;;  %v250_v15 = vadd.f32 %v239_v60, %v210_v61  ;;  %v251_v16 = vadd.f32 %v239_v60, %v211_v62 }
  0xa3   :  { %v258_v19 = vadd.f32 %v239_v60, %v218_v63  ;;  %v259_v20 = vadd.f32 %v239_v60, %v219_v0  ;;  %268 = vst [vmem:[#allocation5 + $0x30] sm:$0xff] %v252_v9  ;;  %269 = vst [vmem:[#allocation5 + $0x38] sm:$0xff] %v253_v10 }
  0xa4   :  { %276 = vst [vmem:[#allocation5 + $0x70] sm:$0xff] %v260_v12  ;;  %277 = vst [vmem:[#allocation5 + $0x78] sm:$0xff] %v261_v13 }
  0xa5   :  { %266 = vst [vmem:[#allocation5 + $0x20] sm:$0xff] %v250_v15  ;;  %267 = vst [vmem:[#allocation5 + $0x28] sm:$0xff] %v251_v16 }
  0xa6   :  { %274 = vst [vmem:[#allocation5 + $0x60] sm:$0xff] %v258_v19  ;;  %275 = vst [vmem:[#allocation5 + $0x68] sm:$0xff] %v259_v20 }
  0xa7   :  { %343 = shalt.err (!%p340_p12)
}
  0xa8   :  { %s344_s17 = scalar_lea.hbm %s520_s3, 2048 }
  0xa9   :  { %p345_p13 = scmp.ne.s32.totalorder %s520_s3, %s344_s17  ;;  %p348_p0 = scmp.lt.u32.totalorder %s344_s17, %s520_s3 }
  0xab   :  { %p350_p1 = pnand %p348_p0, %p345_p13 }
  0xad   :  { %353 = shalt.err (!%p350_p1)
}
  0xae   :  { %289 = dma.vmem_to_hbm [thread:$0]  %s284_s2, 2048, %s520_s3, [#allocation4], %s359_s22, %s359_s22, %s360_s23  }
  0xaf   :  { %356 = dma.done.wait [#allocation4], 2048  }
  0xb0   :  { %357 = vsyncadd [#allocation4], 4294965248 }
  0xb1   :  { %293 = vsyncpa [#allocation3], 1 }
  0xb2   :  { %294 = vsyncpa [#allocation4], 1 }

</bundles_post_ra>
